<compile_context>
chip_gen: v7x
topology: tpu7x:2x2x1
jax: 0.10.0
libtpu: 0.0.40
codegen_flags: <defaults>
</compile_context>

<pallas_src>
import functools

import jax
import jax.numpy as jnp
from jax.experimental import pallas as pl
from jax.experimental.pallas import tpu as pltpu


MXU_DTYPE = jnp.bfloat16
HIDDEN1 = 64          # per-head layer-1 width  -> fused width 128
HIDDEN2 = 32          # per-head layer-2 width  -> fused width 64
OUT_W = 8             # lane-padded fused output width (3 logits + 1 sigmoid + 4 pad)


def _round_up(x, m):
    return ((x + m - 1) // m) * m


def _fused_heads_kernel(x_ref, w1_ref, b1_ref, w2_ref, b2_ref, w3_ref, b3_ref,
                        out_ref, *, chunk):
    """One batch tile: inner chunk loop over 3 fused matmuls (bf16 MXU, f32 acc)."""
    # Weights/biases: loaded once per grid step; VMEM-resident via constant maps.
    w1 = w1_ref[...]
    w2 = w2_ref[...]
    w3 = w3_ref[...]
    b1 = b1_ref[...]
    b2 = b2_ref[...]
    b3 = b3_ref[...]

    n_chunks = x_ref.shape[0] // chunk

    def body(c, carry):
        r = pl.multiple_of(c * chunk, chunk)
        # In-kernel bf16 cast of the raw f32 rows (K=12; MXU pads internally).
        x = x_ref[pl.ds(r, chunk), :].astype(MXU_DTYPE)

        # layer 1: both heads side-by-side, 128 lanes wide
        h1 = jnp.dot(x, w1, preferred_element_type=jnp.float32) + b1
        h1 = jnp.maximum(h1, 0.0)

        # layer 2: block-diagonal packed weights keep the heads independent
        h2 = jnp.dot(h1.astype(MXU_DTYPE), w2,
                     preferred_element_type=jnp.float32) + b2
        h2 = jnp.maximum(h2, 0.0)

        # layer 3: logits in cols 0-2, regressor pre-activation in col 3
        y = jnp.dot(h2.astype(MXU_DTYPE), w3,
                    preferred_element_type=jnp.float32) + b3

        # sigmoid on the regressor column only: exp + approx reciprocal (EUP)
        sig = pl.reciprocal(1.0 + jnp.exp(-y), approx=True)
        col = jax.lax.broadcasted_iota(jnp.int32, y.shape, dimension=1)
        out_ref[pl.ds(r, chunk), :] = jnp.where(col == 3, sig, y)
        return carry

    jax.lax.fori_loop(0, n_chunks, body, 0, unroll=True)


def reimbursement_model_forward(x, packed, *, block_b=8192, chunk_b=512):
    """x: [B, F] float32.  packed: output of pack_params().  Returns (logits, reimb)."""
    B, F = x.shape
    out_w = packed["w3"].shape[1]

    # ---- batch tiling (no batch padding; cdiv grid handles the ragged tail) --
    tb_cap = _round_up(min(block_b, B), 8)
    if tb_cap >= chunk_b:
        chunk = chunk_b
        tb = (tb_cap // chunk) * chunk          # largest multiple of chunk <= cap
    else:
        chunk = tb_cap
        tb = tb_cap
    # v7x has 2 TensorCores: keep >=2 grid steps when the batch allows so the
    # "parallel" batch axis actually shards across them.
    if -(-B // tb) < 2 and tb > chunk:
        tb = max(chunk, _round_up(-(-B // 2), chunk))
    grid = (-(-B // tb),)

    flops = 2 * B * (F * 2 * HIDDEN1 + (2 * HIDDEN1) * (2 * HIDDEN2)
                     + (2 * HIDDEN2) * out_w)
    weight_bytes = sum(int(packed[k].size) * packed[k].dtype.itemsize
                       for k in packed)
    bytes_accessed = B * F * 4 + B * out_w * 4 + weight_bytes

    out = pl.pallas_call(
        functools.partial(_fused_heads_kernel, chunk=chunk),
        grid=grid,
        in_specs=[
            pl.BlockSpec((tb, F), lambda i: (i, 0)),                     # x tile (pipelined)
            pl.BlockSpec((F, 2 * HIDDEN1), lambda i: (0, 0)),            # w1 (resident)
            pl.BlockSpec((1, 2 * HIDDEN1), lambda i: (0, 0)),            # b1
            pl.BlockSpec((2 * HIDDEN1, 2 * HIDDEN2), lambda i: (0, 0)),  # w2
            pl.BlockSpec((1, 2 * HIDDEN2), lambda i: (0, 0)),            # b2
            pl.BlockSpec((2 * HIDDEN2, out_w), lambda i: (0, 0)),        # w3
            pl.BlockSpec((1, out_w), lambda i: (0, 0)),                  # b3
        ],
        out_specs=pl.BlockSpec((tb, out_w), lambda i: (i, 0)),
        out_shape=jax.ShapeDtypeStruct((B, out_w), jnp.float32),
        compiler_params=pltpu.CompilerParams(
            dimension_semantics=("parallel",)),
        cost_estimate=pl.CostEstimate(
            flops=flops, transcendentals=2 * B, bytes_accessed=bytes_accessed),
    )(x, packed["w1"], packed["b1"], packed["w2"], packed["b2"],
      packed["w3"], packed["b3"])

    logits = out[:, :3]
    reimb = out[:, 3:4]
    return logits, reimb


def init_params(key, input_size=12):
    """PyTorch-equivalent params; weights stored as [in, out], biases as [1, out]."""
    def linear(key, fan_in, fan_out):
        kw, kb = jax.random.split(key)
        bound = 1.0 / jnp.sqrt(jnp.float32(fan_in))
        w = jax.random.uniform(kw, (fan_in, fan_out), jnp.float32, -bound, bound)
        b = jax.random.uniform(kb, (1, fan_out), jnp.float32, -bound, bound)
        return w, b

    keys = jax.random.split(key, 6)
    w1c, b1c = linear(keys[0], input_size, HIDDEN1)
    w2c, b2c = linear(keys[1], HIDDEN1, HIDDEN2)
    w3c, b3c = linear(keys[2], HIDDEN2, 3)
    w1r, b1r = linear(keys[3], input_size, HIDDEN1)
    w2r, b2r = linear(keys[4], HIDDEN1, HIDDEN2)
    w3r, b3r = linear(keys[5], HIDDEN2, 1)
    return dict(
        w1c=w1c, b1c=b1c, w2c=w2c, b2c=b2c, w3c=w3c, b3c=b3c,
        w1r=w1r, b1r=b1r, w2r=w2r, b2r=b2r, w3r=w3r, b3r=b3r,
    )


def pack_params(p, input_size=12):
    """Pack both heads into 3 fused (block-diagonal) layers; MXU weights -> bf16."""
    w1 = jnp.concatenate([p["w1c"], p["w1r"]], axis=1)                  # [F, 128]
    b1 = jnp.concatenate([p["b1c"], p["b1r"]], axis=1)                  # [1, 128]

    w2 = jnp.zeros((2 * HIDDEN1, 2 * HIDDEN2), jnp.float32)
    w2 = w2.at[:HIDDEN1, :HIDDEN2].set(p["w2c"])
    w2 = w2.at[HIDDEN1:, HIDDEN2:].set(p["w2r"])
    b2 = jnp.concatenate([p["b2c"], p["b2r"]], axis=1)                  # [1, 64]

    w3 = jnp.zeros((2 * HIDDEN2, OUT_W), jnp.float32)
    w3 = w3.at[:HIDDEN2, :3].set(p["w3c"])
    w3 = w3.at[HIDDEN2:, 3:4].set(p["w3r"])
    b3 = jnp.zeros((1, OUT_W), jnp.float32)
    b3 = b3.at[:, :3].set(p["b3c"]).at[:, 3:4].set(p["b3r"])

    return dict(
        w1=w1.astype(MXU_DTYPE), b1=b1,
        w2=w2.astype(MXU_DTYPE), b2=b2,
        w3=w3.astype(MXU_DTYPE), b3=b3,
    )


def reference_forward(x, p):
    """Pure-JAX f32 reference of the original (unfused) PyTorch forward, eval mode."""
    h = jnp.maximum(x @ p["w1c"] + p["b1c"], 0.0)
    h = jnp.maximum(h @ p["w2c"] + p["b2c"], 0.0)
    logits = h @ p["w3c"] + p["b3c"]
    g = jnp.maximum(x @ p["w1r"] + p["b1r"], 0.0)
    g = jnp.maximum(g @ p["w2r"] + p["b2r"], 0.0)
    reimb = jax.nn.sigmoid(g @ p["w3r"] + p["b3r"])
    return logits, reimb


def packed_reference_forward(x, packed):
    """Precision-matched pure-JAX reference of the fused bf16 data path."""
    xb = x.astype(MXU_DTYPE)
    h1 = jnp.maximum(
        jnp.dot(xb, packed["w1"], preferred_element_type=jnp.float32) + packed["b1"], 0.0)
    h2 = jnp.maximum(
        jnp.dot(h1.astype(MXU_DTYPE), packed["w2"],
                preferred_element_type=jnp.float32) + packed["b2"], 0.0)
    y = jnp.dot(h2.astype(MXU_DTYPE), packed["w3"],
                preferred_element_type=jnp.float32) + packed["b3"]
    return y[:, :3], jax.nn.sigmoid(y[:, 3:4])


if __name__ == "__main__":
    key = jax.random.PRNGKey(0)
    k_params, k_x, k_x2 = jax.random.split(key, 3)

    input_size = 12
    batch = 8
    params = init_params(k_params, input_size=input_size)
    packed = pack_params(params, input_size=input_size)
    x = jax.random.normal(k_x, (batch, input_size), dtype=jnp.float32)

    fwd = jax.jit(functools.partial(reimbursement_model_forward,
                                    block_b=8192, chunk_b=512))
    logits, reimb = fwd(x, packed)
    jax.block_until_ready((logits, reimb))

    assert logits.shape == (batch, 3) and reimb.shape == (batch, 1)

    # Tight check against a precision-matched (bf16-input, f32-accumulate) reference.
    pk_logits, pk_reimb = packed_reference_forward(x, packed)
    assert jnp.allclose(logits, pk_logits, atol=1e-4, rtol=1e-4), "logits mismatch (packed ref)"
    assert jnp.allclose(reimb, pk_reimb, atol=1e-2), "reimb mismatch (packed ref)"

    # Loose check against the original-semantics f32 unfused reference
    # (slack accounts for bf16 input/weight quantization).
    f32_logits, f32_reimb = reference_forward(x, params)
    assert jnp.allclose(logits, f32_logits, atol=5e-2, rtol=5e-2), "logits mismatch (f32 ref)"
    assert jnp.allclose(reimb, f32_reimb, atol=5e-2), "reimb mismatch (f32 ref)"

    # Ragged-batch / multi-step path: cdiv grid, partial last block, inner chunk
    # loop, and >=2 grid steps (v7x parallel axis).
    batch2 = 300
    x2 = jax.random.normal(k_x2, (batch2, input_size), dtype=jnp.float32)
    fwd2 = jax.jit(functools.partial(reimbursement_model_forward,
                                     block_b=256, chunk_b=64))
    logits2, reimb2 = fwd2(x2, packed)
    jax.block_until_ready((logits2, reimb2))
    assert logits2.shape == (batch2, 3) and reimb2.shape == (batch2, 1)
    pk_logits2, pk_reimb2 = packed_reference_forward(x2, packed)
    assert jnp.allclose(logits2, pk_logits2, atol=1e-4, rtol=1e-4), "logits mismatch (ragged)"
    assert jnp.allclose(reimb2, pk_reimb2, atol=1e-2), "reimb mismatch (ragged)"

    print("KERNEL_OK")
</pallas_src>

<mosaic_0001>
module attributes {stable_mosaic.version = 11 : i64} {
  func.func @_fused_heads_kernel(%arg0: i32, %arg1: memref<8x12xf32, #tpu.memory_space<vmem>>, %arg2: memref<12x128xbf16, #tpu.memory_space<vmem>>, %arg3: memref<1x128xf32, #tpu.memory_space<vmem>>, %arg4: memref<128x64xbf16, #tpu.memory_space<vmem>>, %arg5: memref<1x64xf32, #tpu.memory_space<vmem>>, %arg6: memref<64x8xbf16, #tpu.memory_space<vmem>>, %arg7: memref<1x8xf32, #tpu.memory_space<vmem>>, %arg8: memref<8x8xf32, #tpu.memory_space<vmem>>) attributes {dimension_semantics = [#tpu.dimension_semantics<parallel>], iteration_bounds = array<i64: 1>, scalar_prefetch = 0 : i64, scratch_operands = 0 : i64, tpu.core_type = #tpu.core_type<tc>, window_params = [{transform_indices = @transform_0, window_bounds = array<i64: 8, 12>}, {pipeline_mode = #tpu.pipeline_mode<synchronous>, transform_indices = @transform_1, window_bounds = array<i64: 12, 128>}, {pipeline_mode = #tpu.pipeline_mode<synchronous>, transform_indices = @transform_2, window_bounds = array<i64: 1, 128>}, {pipeline_mode = #tpu.pipeline_mode<synchronous>, transform_indices = @transform_3, window_bounds = array<i64: 128, 64>}, {pipeline_mode = #tpu.pipeline_mode<synchronous>, transform_indices = @transform_4, window_bounds = array<i64: 1, 64>}, {pipeline_mode = #tpu.pipeline_mode<synchronous>, transform_indices = @transform_5, window_bounds = array<i64: 64, 8>}, {pipeline_mode = #tpu.pipeline_mode<synchronous>, transform_indices = @transform_6, window_bounds = array<i64: 1, 8>}, {transform_indices = @transform_7, window_bounds = array<i64: 8, 8>}]} {
    %c0 = arith.constant 0 : index
    %c0_0 = arith.constant 0 : index
    %0 = vector.load %arg2[%c0, %c0_0] : memref<12x128xbf16, #tpu.memory_space<vmem>>, vector<12x128xbf16>
    %c0_1 = arith.constant 0 : index
    %c0_2 = arith.constant 0 : index
    %1 = vector.load %arg4[%c0_1, %c0_2] : memref<128x64xbf16, #tpu.memory_space<vmem>>, vector<128x64xbf16>
    %c0_3 = arith.constant 0 : index
    %c0_4 = arith.constant 0 : index
    %2 = vector.load %arg6[%c0_3, %c0_4] : memref<64x8xbf16, #tpu.memory_space<vmem>>, vector<64x8xbf16>
    %c0_5 = arith.constant 0 : index
    %c0_6 = arith.constant 0 : index
    %3 = vector.load %arg3[%c0_5, %c0_6] : memref<1x128xf32, #tpu.memory_space<vmem>>, vector<1x128xf32>
    %c0_7 = arith.constant 0 : index
    %c0_8 = arith.constant 0 : index
    %4 = vector.load %arg5[%c0_7, %c0_8] : memref<1x64xf32, #tpu.memory_space<vmem>>, vector<1x64xf32>
    %c0_9 = arith.constant 0 : index
    %c0_10 = arith.constant 0 : index
    %5 = vector.load %arg7[%c0_9, %c0_10] : memref<1x8xf32, #tpu.memory_space<vmem>>, vector<1x8xf32>
    %c0_i32 = arith.constant 0 : i32
    %c8_i32 = arith.constant 8 : i32
    %6 = arith.muli %c0_i32, %c8_i32 : i32
    %7 = tpu.assume_multiple %6, 8 : i32
    %8 = arith.index_cast %7 : i32 to index
    %c0_11 = arith.constant 0 : index
    %9 = vector.load %arg1[%8, %c0_11] : memref<8x12xf32, #tpu.memory_space<vmem>>, vector<8x12xf32>
    %10 = arith.truncf %9 : vector<8x12xf32> to vector<8x12xbf16>
    %cst = arith.constant dense<0.000000e+00> : vector<8x128xf32>
    %11 = tpu.matmul %10, %0, %cst {dimension_numbers = #tpu.dot_dimension_numbers<[1], [0], [0], [1], [0, 0, 1, 1], [], []>} : vector<8x12xbf16>, vector<12x128xbf16>, vector<8x128xf32> -> vector<8x128xf32>
    %12 = vector.broadcast %3 : vector<1x128xf32> to vector<8x128xf32>
    %13 = arith.addf %11, %12 : vector<8x128xf32>
    %cst_12 = arith.constant 0.000000e+00 : f32
    %14 = vector.broadcast %cst_12 : f32 to vector<8x128xf32>
    %15 = arith.maximumf %13, %14 : vector<8x128xf32>
    %16 = arith.truncf %15 : vector<8x128xf32> to vector<8x128xbf16>
    %cst_13 = arith.constant dense<0.000000e+00> : vector<8x64xf32>
    %17 = tpu.matmul %16, %1, %cst_13 {dimension_numbers = #tpu.dot_dimension_numbers<[1], [0], [0], [1], [0, 0, 1, 1], [], []>} : vector<8x128xbf16>, vector<128x64xbf16>, vector<8x64xf32> -> vector<8x64xf32>
    %18 = vector.broadcast %4 : vector<1x64xf32> to vector<8x64xf32>
    %19 = arith.addf %17, %18 : vector<8x64xf32>
    %cst_14 = arith.constant 0.000000e+00 : f32
    %20 = vector.broadcast %cst_14 : f32 to vector<8x64xf32>
    %21 = arith.maximumf %19, %20 : vector<8x64xf32>
    %22 = arith.truncf %21 : vector<8x64xf32> to vector<8x64xbf16>
    %cst_15 = arith.constant dense<0.000000e+00> : vector<8x8xf32>
    %23 = tpu.matmul %22, %2, %cst_15 {dimension_numbers = #tpu.dot_dimension_numbers<[1], [0], [0], [1], [0, 0, 1, 1], [], []>} : vector<8x64xbf16>, vector<64x8xbf16>, vector<8x8xf32> -> vector<8x8xf32>
    %24 = vector.broadcast %5 : vector<1x8xf32> to vector<8x8xf32>
    %25 = arith.addf %23, %24 : vector<8x8xf32>
    %cst_16 = arith.constant 0.000000e+00 : f32
    %26 = vector.broadcast %cst_16 : f32 to vector<8x8xf32>
    %27 = arith.subf %26, %25 : vector<8x8xf32>
    %28 = math.exp %27 : vector<8x8xf32>
    %cst_17 = arith.constant 1.000000e+00 : f32
    %29 = vector.broadcast %cst_17 : f32 to vector<8x8xf32>
    %30 = arith.addf %29, %28 : vector<8x8xf32>
    %31 = tpu.reciprocal %30 {approx = true} : vector<8x8xf32> -> vector<8x8xf32>
    %32 = tpu.iota {dimensions = array<i32: 1>} : vector<8x8xi32>
    %c3_i32 = arith.constant 3 : i32
    %33 = vector.broadcast %c3_i32 : i32 to vector<8x8xi32>
    %34 = arith.cmpi eq, %32, %33 : vector<8x8xi32>
    %35 = arith.select %34, %31, %25 : vector<8x8xi1>, vector<8x8xf32>
    %36 = arith.index_cast %7 : i32 to index
    %c0_18 = arith.constant 0 : index
    %37 = vector.load %arg8[%36, %c0_18] : memref<8x8xf32, #tpu.memory_space<vmem>>, vector<8x8xf32>
    tpu.vector_store %arg8[%36, %c0_18], %35 {strides = array<i32>} : memref<8x8xf32, #tpu.memory_space<vmem>>, vector<8x8xf32>,
    %c1_i32 = arith.constant 1 : i32
    return
  }
  func.func @transform_0(%arg0: i32) -> (i32, i32) {
    %c0_i32 = arith.constant 0 : i32
    %c0_i32_0 = arith.constant 0 : i32
    return %arg0, %c0_i32 : i32, i32
  }
  func.func @transform_1(%arg0: i32) -> (i32, i32) {
    %c0_i32 = arith.constant 0 : i32
    %c0_i32_0 = arith.constant 0 : i32
    %c0_i32_1 = arith.constant 0 : i32
    return %c0_i32, %c0_i32_0 : i32, i32
  }
  func.func @transform_2(%arg0: i32) -> (i32, i32) {
    %c0_i32 = arith.constant 0 : i32
    %c0_i32_0 = arith.constant 0 : i32
    %c0_i32_1 = arith.constant 0 : i32
    return %c0_i32, %c0_i32_0 : i32, i32
  }
  func.func @transform_3(%arg0: i32) -> (i32, i32) {
    %c0_i32 = arith.constant 0 : i32
    %c0_i32_0 = arith.constant 0 : i32
    %c0_i32_1 = arith.constant 0 : i32
    return %c0_i32, %c0_i32_0 : i32, i32
  }
  func.func @transform_4(%arg0: i32) -> (i32, i32) {
    %c0_i32 = arith.constant 0 : i32
    %c0_i32_0 = arith.constant 0 : i32
    %c0_i32_1 = arith.constant 0 : i32
    return %c0_i32, %c0_i32_0 : i32, i32
  }
  func.func @transform_5(%arg0: i32) -> (i32, i32) {
    %c0_i32 = arith.constant 0 : i32
    %c0_i32_0 = arith.constant 0 : i32
    %c0_i32_1 = arith.constant 0 : i32
    return %c0_i32, %c0_i32_0 : i32, i32
  }
  func.func @transform_6(%arg0: i32) -> (i32, i32) {
    %c0_i32 = arith.constant 0 : i32
    %c0_i32_0 = arith.constant 0 : i32
    %c0_i32_1 = arith.constant 0 : i32
    return %c0_i32, %c0_i32_0 : i32, i32
  }
  func.func @transform_7(%arg0: i32) -> (i32, i32) {
    %c0_i32 = arith.constant 0 : i32
    %c0_i32_0 = arith.constant 0 : i32
    return %arg0, %c0_i32 : i32, i32
  }
}

</mosaic_0001>

<bundles_post_ra>
// kernel: reimbursement_model_forward.1
= control target key start
LH: loop header
LB: loop body
LE: loop exit
PB: predicated region body
PF: predicated region fallthrough
CT: control target
= control target key end

     0   :  { %vm73_vm0 = vcmask 1045504   ;;  %v395_v0 = vmov 0.0   ;;  %vm396_vm1 = vmmov 0   ;;  %vm69_vm2 = vcmask 97280   ;;  %s494_s1 = inlined_call_operand.vmem [shape: bf16[12,128], index: 1, kind: input, shape index: {}]   ;;  %s495_s0 = inlined_call_operand.vmem [shape: f32[8,12], index: 0, kind: input, shape index: {}]   ;;  %s496_s3 = inlined_call_operand.vmem [shape: bf16[128,64], index: 3, kind: input, shape index: {}]   ;;  %s497_s5 = inlined_call_operand.vmem [shape: bf16[64,8], index: 5, kind: input, shape index: {}]   ;;  %s498_s2 = inlined_call_operand.vmem [shape: f32[1,128], index: 2, kind: input, shape index: {}]   ;;  %s499_s4 = inlined_call_operand.vmem [shape: f32[1,64], index: 4, kind: input, shape index: {}]   ;;  %s500_s6 = inlined_call_operand.vmem [shape: f32[1,8], index: 6, kind: input, shape index: {}]   ;;  %s501_s7 = inlined_call_operand.vmem [shape: f32[8,8], index: 7, kind: output, shape index: {}]  }
   0x1   :  { %338 = vmatprep.subr.bf16.mxu0 %v395_v0  ;;  %v378_v1 = vld [vmem:[%s494_s1] sm:$0x3f]   ;;  %340 = vmatprep.mubr.msk.bf16.mxu0 %vm396_vm1, %v395_v0  ;;  %v380_v6 = vld [vmem:[%s496_s3 + $0x8] sm:$0xff]   ;;  %v381_v7 = vld [vmem:[%s496_s3 + $0x10] sm:$0xff]   ;;  %vm245_vm3 = vcmask 523264   ;;  %v294_v43 = vlaneseq  ;;  %vm298_vm5 = vcmask 64512  }
   0x2   :  { %v56_v2 = vld [vmem:[%s495_s0] sm:$0xff]  ;;  %344 = vmatprep.subr.bf16.mxu1 %v395_v0  ;;  %360 = vmatprep.mubr.msk.bf16.mxu1 %vm396_vm1, %v395_v0  ;;  %v75_v3 = vsel %vm73_vm0, %v378_v1, 0  ;;  %v382_v8 = vld [vmem:[%s496_s3 + $0x18] sm:$0xff]   ;;  %v384_v10 = vld [vmem:[%s496_s3 + $0x28] sm:$0xff]  }
   0x3   :  { %v57_v4 = vpack.c.bf16 %v56_v2, %v56_v2  ;;  %v379_v5 = vld [vmem:[%s496_s3] sm:$0xff]   ;;  %339 = vmatpush3.bf16.msra.mxu0 %v75_v3  ;;  %v385_v11 = vld [vmem:[%s496_s3 + $0x30] sm:$0xff]   ;;  %v386_v12 = vld [vmem:[%s496_s3 + $0x38] sm:$0xff]   ;;  %v295_v44 = vand.u32 127, %v294_v43 }
   0x4   :  { %345 = vmatpush3.bf16.msra.mxu1 %v379_v5  ;;  %364 = vmatprep.subr.bf16.mxu0 %v395_v0  ;;  %v383_v9 = vld [vmem:[%s496_s3 + $0x20] sm:$0xff]   ;;  %v388_v14 = vld [vmem:[%s497_s5 + $0x8] sm:$0xff]   ;;  %v389_v23 = vld [vmem:[%s497_s5 + $0x10] sm:$0xff]  }
   0x5   :  { %346 = vmatprep.subr.bf16.mxu1 %v395_v0  ;;  %v387_v13 = vld [vmem:[%s497_s5] sm:$0xff]   ;;  %v390_v24 = vld [vmem:[%s497_s5 + $0x18] sm:$0xff]   ;;  %vm296_vm4 = vcmp.eq.s32.totalorder %v295_v44, 3 }
   0x6   :  { %341 = vmatmul.mubr.msk.bf16.vlgmr.msra.gmra.mrb[0].mxu0 %vm69_vm2, %v57_v4  ;;  %v304_v15 = vld [vmem:[%s498_s2] ss:$0 sm:$0xff] }
   0x7   :  { %372 = vmatprep.mubr.msk.bf16.mxu0 %vm396_vm1, %v395_v0  ;;  %365 = vmatpush3.bf16.msra.mxu0 %v387_v13  ;;  %v307_v25 = vld [vmem:[%s499_s4] ss:$0 sm:$0xff] }
   0x8   :  { %347 = vmatpush3.bf16.msra.mxu1 %v380_v6  ;;  %366 = vmatprep.subr.bf16.mxu0 %v395_v0  ;;  %v316_v33 = vld [vmem:[%s500_s6] ss:$0 sm:$0xff] }
   0x9   :  { %348 = vmatprep.subr.bf16.mxu1 %v395_v0 }
   0xb   :  { %367 = vmatpush3.bf16.msra.mxu0 %v388_v14 }
   0xc   :  { %349 = vmatpush3.bf16.msra.mxu1 %v381_v7  ;;  %368 = vmatprep.subr.bf16.mxu0 %v395_v0 }
   0xd   :  { %350 = vmatprep.subr.bf16.mxu1 %v395_v0 }
   0xf   :  { %369 = vmatpush3.bf16.msra.mxu0 %v389_v23 }
  0x10   :  { %351 = vmatpush3.bf16.msra.mxu1 %v382_v8  ;;  %370 = vmatprep.subr.bf16.mxu0 %v395_v0 }
  0x11   :  { %352 = vmatprep.subr.bf16.mxu1 %v395_v0 }
  0x13   :  { %371 = vmatpush3.bf16.msra.mxu0 %v390_v24 }
  0x14   :  { %353 = vmatpush3.bf16.msra.mxu1 %v383_v9 }
  0x15   :  { %354 = vmatprep.subr.bf16.mxu1 %v395_v0 }
  0x18   :  { %355 = vmatpush3.bf16.msra.mxu1 %v384_v10 }
  0x19   :  { %356 = vmatprep.subr.bf16.mxu1 %v395_v0 }
  0x1c   :  { %357 = vmatpush3.bf16.msra.mxu1 %v385_v11 }
  0x1d   :  { %358 = vmatprep.subr.bf16.mxu1 %v395_v0 }
  0x20   :  { %359 = vmatpush3.bf16.msra.mxu1 %v386_v12 }
  0xd9   :  { %v111_v16 = vpop.f32.mrb[0].mxu0 }
  0xda   :  { %v112_v17 = vadd.f32 %v304_v15, %v111_v16  ;;  %v342_v18 = vpop.f32.mrb[1].mxu0 }
  0xdb   :  { %v114_v19 = vpop.f32.mrb[2].mxu0 }
  0xdc   :  { %v117_v20 = vmax.f32 %v112_v17, 0.0  ;;  %v343_v21 = vpop.f32.mrb[3].mxu0 }
  0xde   :  { %v118_v22 = vpack.c.bf16 %v117_v20, %v117_v20 }
  0xe0   :  { %361 = vmatmul.mubr.bf16.vlgmr.msra.gmra.mrb[0].mxu1 %v118_v22 }
 0x1b3   :  { %v207_v26 = vpop.f32.mrb[0].mxu1 }
 0x1b4   :  { %v208_v27 = vadd.f32 %v307_v25, %v207_v26  ;;  %v362_v28 = vpop.f32.mrb[1].mxu1 }
 0x1b5   :  { %v210_v29 = vpop.f32.mrb[2].mxu1 }
 0x1b6   :  { %v213_v30 = vmax.f32 %v208_v27, 0.0  ;;  %v363_v31 = vpop.f32.mrb[3].mxu1 }
 0x1b8   :  { %v214_v32 = vpack.c.bf16 %v213_v30, %v213_v30 }
 0x1ba   :  { %373 = vmatmul.mubr.msk.bf16.vlgmr.msra.gmra.mrb[4].mxu0 %vm245_vm3, %v214_v32 }
 0x28d   :  { %v283_v34 = vpop.f32.mrb[4].mxu0 }
 0x28e   :  { %v284_v35 = vadd.f32 %v316_v33, %v283_v34  ;;  %v374_v36 = vpop.f32.mrb[5].mxu0 }
 0x28f   :  { %v286_v37 = vpop.f32.mrb[6].mxu0 }
 0x290   :  { %v289_v38 = vsub.f32 0.0, %v284_v35  ;;  %v375_v39 = vpop.f32.mrb[7].mxu0 }
 0x292   :  { %v290_v40 = vmul.f32 1.442695, %v289_v38 }
 0x294   :  { %391 = vpow2.f32 %v290_v40 }
 0x29e   :  { %v392_v41 = vpop.eup %391 }
 0x29f   :  { %v292_v42 = vadd.f32 1.0, %v392_v41 }
 0x2a1   :  { %393 = vrcp.f32 %v292_v42 }
 0x2ab   :  { %v394_v45 = vpop.eup %393 }
 0x2ac   :  { %v297_v46 = vsel %vm296_vm4, %v394_v45, %v284_v35 }
 0x2ad   :  { %299 = vst.msk [vmem:[%s501_s7] sm:$0xff] %vm298_vm5, %v297_v46 }

</bundles_post_ra>
